<compile_context>
chip_gen: v5e
topology: v5e:2x2
jax: 0.10.0
libtpu: 0.0.40
codegen_flags: <defaults>
</compile_context>

<pallas_src>
import functools

import jax
import jax.numpy as jnp
from jax import lax
from jax.experimental import pallas as pl
from jax.experimental.pallas import tpu as pltpu


def _round_up(x, m):
    return (x + m - 1) // m * m


# ----------------------------- Pallas kernel ------------------------------ #
def _fused_conv_relu_kernel(x_ref, w_ref, b_ref, o_ref, *, row_offsets, OH,
                            B_tile, out_w):
    """One grid step: conv + bias + ReLU for B_tile batch elements.

    x_ref : (B_tile, R, Kc_pad)   bf16 rows (H zero-padded), (w,cin) on lanes
    w_ref : (KH*Kc_pad, out_w)    bf16 banded weights ((kw,cin) folded in)
    b_ref : (1, out_w)            f32 bias tiled over ow
    o_ref : (B_tile, OH, out_w)   lane-dense output slab
    """
    kc = x_ref.shape[-1]
    # Build the (B_tile*OH, KH*Kc_pad) LHS by lane-concatenating the KH shifted
    # row slices (all offsets/widths static, lane boundaries 128-aligned).
    pieces = []
    for off in row_offsets:                                  # static, len == KH
        p = x_ref[:, pl.ds(off, OH), :]                      # (B_tile, OH, Kc_pad)
        pieces.append(p.reshape(B_tile * OH, kc))
    xcat = pieces[0] if len(pieces) == 1 else jnp.concatenate(pieces, axis=1)
    # Single fused MXU dot (f32 accumulation).
    acc = jnp.dot(xcat, w_ref[...], preferred_element_type=jnp.float32)
    acc = acc + b_ref[...]                                   # bias in f32
    o_ref[...] = jnp.maximum(acc, 0.0).reshape(B_tile, OH, out_w).astype(o_ref.dtype)


# ------------------------------ Wrapper ------------------------------------ #
def alias_conv_block(x_nchw, weight, bias, *, stride, padding,
                     compute_dtype=jnp.bfloat16, out_dtype=jnp.float32):
    """Forward of AliasConvBlock(norm='none', activation='relu', pad_type='zero').

    x_nchw : (N, Cin, H, W)
    weight : (Cout, Cin, KH, KW)   (PyTorch conv weight layout)
    bias   : (Cout,)
    """
    # TODO(synk): norm branches ('bn'/'in'/'ln'/'adain'), non-'relu' activations
    # and 'reflect'/'replicate' padding are not exercised by the default config
    # and are not implemented here.
    N, Cin, H, W = x_nchw.shape
    Cout, _, KH, KW = weight.shape
    OH = (H + 2 * padding - KH) // stride + 1
    OW = (W + 2 * padding - KW) // stride + 1
    out_w = OW * Cout

    pack = 8 * 4 // jnp.dtype(compute_dtype).itemsize        # sublane pack (16 bf16)
    Kc = W * Cin
    Kc_pad = _round_up(Kc, 128)      # lane pad -> vreg-aligned in-kernel concat

    # --- activation layout: NCHW -> (N, rows, Kc_pad); height zero-pad folded in.
    # Under jit the transpose + pad + cast fuse into a single XLA copy pass.
    x_rows = jnp.transpose(x_nchw, (0, 2, 3, 1)).reshape(N, H, Kc)
    if stride == 1:
        R = _round_up(H + 2 * padding, pack)
        x_flat = jnp.pad(x_rows, ((0, 0), (padding, R - H - padding),
                                  (0, Kc_pad - Kc)))
        row_offsets = tuple(range(KH))
    else:
        # Pre-decimate rows in the wrapper so the kernel only does unit-stride,
        # sublane-aligned row slices.
        Hp = H + 2 * padding
        xp = jnp.pad(x_rows, ((0, 0), (padding, Hp - H - padding),
                              (0, Kc_pad - Kc)))
        idx = (jnp.arange(OH)[None, :] * stride
               + jnp.arange(KH)[:, None]).reshape(-1)        # (KH*OH,)
        x_dec = jnp.take(xp, idx, axis=1).reshape(N, KH, OH, Kc_pad)
        OH_seg = _round_up(OH, pack)
        x_dec = jnp.pad(x_dec, ((0, 0), (0, 0), (0, OH_seg - OH), (0, 0)))
        R = KH * OH_seg
        x_flat = x_dec.reshape(N, R, Kc_pad)
        row_offsets = tuple(kh * OH_seg for kh in range(KH))
    x_flat = x_flat.astype(compute_dtype)

    # --- Banded weights over the UNPADDED width: width zero-pad folded into the
    # band, (kw,cin) im2col folded into the (tiny, static) weight tensor.
    # w_band[kh*Kc_pad + w*Cin + cin, ow*Cout + co] =
    #     weight[co, cin, kh, w + padding - ow*stride] if that kw is valid else 0.
    w_hw = jnp.transpose(weight, (2, 3, 1, 0)).astype(jnp.float32)   # (KH,KW,Cin,Cout)
    w_pos = jnp.arange(W)[:, None]                                   # (W,1)
    ow_pos = jnp.arange(OW)[None, :]                                 # (1,OW)
    kw_rel = w_pos + padding - ow_pos * stride                       # (W,OW)
    valid = (kw_rel >= 0) & (kw_rel < KW)
    kw_cl = jnp.clip(kw_rel, 0, KW - 1)
    gathered = w_hw[:, kw_cl]                                        # (KH,W,OW,Cin,Cout)
    band = jnp.where(valid[None, :, :, None, None], gathered, 0.0)
    band = jnp.transpose(band, (0, 1, 3, 2, 4)).reshape(KH, Kc, out_w)
    band = jnp.pad(band, ((0, 0), (0, Kc_pad - Kc), (0, 0)))
    w_band = band.reshape(KH * Kc_pad, out_w).astype(compute_dtype)

    # --- Bias tiled to the lane-dense (ow, cout) output layout, kept f32.
    bias_row = jnp.tile(bias.astype(jnp.float32), OW).reshape(1, out_w)

    # --- Fold batch into the MXU M dimension: few fat grid steps.
    B_tile = 1
    for b in range(1, N + 1):
        if N % b == 0 and b * OH <= 256:                     # fill v6e/v7x MXU rows
            B_tile = b
    grid = (N // B_tile,)                                    # N=2 -> grid=(1,)

    kernel = functools.partial(_fused_conv_relu_kernel, row_offsets=row_offsets,
                               OH=OH, B_tile=B_tile, out_w=out_w)

    out = pl.pallas_call(
        kernel,
        out_shape=jax.ShapeDtypeStruct((N, OH, out_w), out_dtype),
        grid_spec=pltpu.PrefetchScalarGridSpec(
            num_scalar_prefetch=0,
            grid=grid,
            in_specs=[
                pl.BlockSpec((B_tile, R, Kc_pad), lambda n: (n, 0, 0)),
                # Weight / bias index maps are constant across the grid; with
                # grid=(1,) for the default shape no second buffer is ever used.
                pl.BlockSpec((KH * Kc_pad, out_w), lambda n: (0, 0)),
                pl.BlockSpec((1, out_w), lambda n: (0, 0)),
            ],
            out_specs=pl.BlockSpec((B_tile, OH, out_w), lambda n: (n, 0, 0)),
        ),
        compiler_params=pltpu.CompilerParams(
            dimension_semantics=("parallel",),
        ),
    )(x_flat, w_band, bias_row)

    out_nhwc = out.reshape(N, OH, OW, Cout)
    # TODO(synk): if the downstream consumer accepts NHWC, skip this transpose.
    return jnp.transpose(out_nhwc, (0, 3, 1, 2)).astype(jnp.float32)   # NCHW


# ------------------------------ Main --------------------------------------- #
if __name__ == "__main__":
    # Module config: AliasConvBlock(input_dim=4, output_dim=8, kernel_size=3,
    #                               stride=1, padding=1, norm='none',
    #                               activation='relu', pad_type='zero')
    N, Cin, H, W = 2, 4, 16, 16
    Cout, KH, KW = 8, 3, 3
    stride, padding = 1, 1

    key = jax.random.PRNGKey(0)
    kx, kwt, kb = jax.random.split(key, 3)
    x = jax.random.normal(kx, (N, Cin, H, W), dtype=jnp.float32)
    fan_in = Cin * KH * KW
    weight = jax.random.normal(kwt, (Cout, Cin, KH, KW), dtype=jnp.float32) / jnp.sqrt(fan_in)
    bias = jax.random.normal(kb, (Cout,), dtype=jnp.float32) * 0.1

    fwd = jax.jit(functools.partial(alias_conv_block, stride=stride, padding=padding))
    out = jax.block_until_ready(fwd(x, weight, bias))

    # Reference: XLA conv on bf16-rounded operands (matches the kernel's MXU input
    # precision; accumulation in both paths is f32).
    xq = x.astype(jnp.bfloat16).astype(jnp.float32)
    wq = weight.astype(jnp.bfloat16).astype(jnp.float32)
    ref = lax.conv_general_dilated(
        xq, wq, window_strides=(stride, stride),
        padding=((padding, padding), (padding, padding)),
        dimension_numbers=("NCHW", "OIHW", "NCHW"),
    ) + bias.reshape(1, Cout, 1, 1)
    ref = jnp.maximum(ref, 0.0)

    assert out.shape == (N, Cout, H, W), out.shape
    err = float(jnp.max(jnp.abs(out - ref)))
    assert err < 2e-2, f"max abs err {err}"

    print("KERNEL_OK")
</pallas_src>

<mosaic_0001>
module attributes {stable_mosaic.version = 11 : i64} {
  func.func @_fused_conv_relu_kernel(%arg0: i32, %arg1: memref<2x32x128xbf16, #tpu.memory_space<vmem>>, %arg2: memref<384x128xbf16, #tpu.memory_space<vmem>>, %arg3: memref<1x128xf32, #tpu.memory_space<vmem>>, %arg4: memref<2x16x128xf32, #tpu.memory_space<vmem>>) attributes {dimension_semantics = [#tpu.dimension_semantics<parallel>], iteration_bounds = array<i64: 1>, scalar_prefetch = 0 : i64, scratch_operands = 0 : i64, tpu.core_type = #tpu.core_type<tc>, window_params = [{transform_indices = @transform_0, window_bounds = array<i64: 2, 32, 128>}, {pipeline_mode = #tpu.pipeline_mode<synchronous>, transform_indices = @transform_1, window_bounds = array<i64: 384, 128>}, {pipeline_mode = #tpu.pipeline_mode<synchronous>, transform_indices = @transform_2, window_bounds = array<i64: 1, 128>}, {transform_indices = @transform_3, window_bounds = array<i64: 2, 16, 128>}]} {
    %c0 = arith.constant 0 : index
    %c0_0 = arith.constant 0 : index
    %c0_1 = arith.constant 0 : index
    %0 = vector.load %arg1[%c0, %c0_0, %c0_1] : memref<2x32x128xbf16, #tpu.memory_space<vmem>>, vector<2x16x128xbf16>
    %1 = vector.shape_cast %0 : vector<2x16x128xbf16> to vector<32x128xbf16>
    %c0_2 = arith.constant 0 : index
    %c1 = arith.constant 1 : index
    %c0_3 = arith.constant 0 : index
    %2 = vector.load %arg1[%c0_2, %c1, %c0_3] : memref<2x32x128xbf16, #tpu.memory_space<vmem>>, vector<2x16x128xbf16>
    %3 = vector.shape_cast %2 : vector<2x16x128xbf16> to vector<32x128xbf16>
    %c0_4 = arith.constant 0 : index
    %c2 = arith.constant 2 : index
    %c0_5 = arith.constant 0 : index
    %4 = vector.load %arg1[%c0_4, %c2, %c0_5] : memref<2x32x128xbf16, #tpu.memory_space<vmem>>, vector<2x16x128xbf16>
    %5 = vector.shape_cast %4 : vector<2x16x128xbf16> to vector<32x128xbf16>
    %6 = tpu.concatenate %1, %3, %5 in 1 : vector<32x128xbf16>, vector<32x128xbf16>, vector<32x128xbf16> -> vector<32x384xbf16>
    %c0_6 = arith.constant 0 : index
    %c0_7 = arith.constant 0 : index
    %7 = vector.load %arg2[%c0_6, %c0_7] : memref<384x128xbf16, #tpu.memory_space<vmem>>, vector<384x128xbf16>
    %cst = arith.constant dense<0.000000e+00> : vector<32x128xf32>
    %8 = tpu.matmul %6, %7, %cst {dimension_numbers = #tpu.dot_dimension_numbers<[1], [0], [0], [1], [0, 0, 1, 1], [], []>} : vector<32x384xbf16>, vector<384x128xbf16>, vector<32x128xf32> -> vector<32x128xf32>
    %c0_8 = arith.constant 0 : index
    %c0_9 = arith.constant 0 : index
    %9 = vector.load %arg3[%c0_8, %c0_9] : memref<1x128xf32, #tpu.memory_space<vmem>>, vector<1x128xf32>
    %10 = vector.broadcast %9 : vector<1x128xf32> to vector<32x128xf32>
    %11 = arith.addf %8, %10 : vector<32x128xf32>
    %cst_10 = arith.constant 0.000000e+00 : f32
    %12 = vector.broadcast %cst_10 : f32 to vector<32x128xf32>
    %13 = arith.maximumf %11, %12 : vector<32x128xf32>
    %14 = vector.shape_cast %13 : vector<32x128xf32> to vector<2x16x128xf32>
    %c0_11 = arith.constant 0 : index
    %c0_12 = arith.constant 0 : index
    %c0_13 = arith.constant 0 : index
    %15 = vector.load %arg4[%c0_11, %c0_12, %c0_13] : memref<2x16x128xf32, #tpu.memory_space<vmem>>, vector<2x16x128xf32>
    tpu.vector_store %arg4[%c0_11, %c0_12, %c0_13], %14 {strides = array<i32>} : memref<2x16x128xf32, #tpu.memory_space<vmem>>, vector<2x16x128xf32>,
    return
  }
  func.func @transform_0(%arg0: i32) -> (i32, i32, i32) {
    %c0_i32 = arith.constant 0 : i32
    %c0_i32_0 = arith.constant 0 : i32
    %c0_i32_1 = arith.constant 0 : i32
    return %arg0, %c0_i32, %c0_i32_0 : i32, i32, i32
  }
  func.func @transform_1(%arg0: i32) -> (i32, i32) {
    %c0_i32 = arith.constant 0 : i32
    %c0_i32_0 = arith.constant 0 : i32
    %c0_i32_1 = arith.constant 0 : i32
    return %c0_i32, %c0_i32_0 : i32, i32
  }
  func.func @transform_2(%arg0: i32) -> (i32, i32) {
    %c0_i32 = arith.constant 0 : i32
    %c0_i32_0 = arith.constant 0 : i32
    %c0_i32_1 = arith.constant 0 : i32
    return %c0_i32, %c0_i32_0 : i32, i32
  }
  func.func @transform_3(%arg0: i32) -> (i32, i32, i32) {
    %c0_i32 = arith.constant 0 : i32
    %c0_i32_0 = arith.constant 0 : i32
    %c0_i32_1 = arith.constant 0 : i32
    return %arg0, %c0_i32, %c0_i32_0 : i32, i32, i32
  }
}

</mosaic_0001>

<bundles_post_ra>
// kernel: tile.8
= control target key start
LH: loop header
LB: loop body
LE: loop exit
PB: predicated region body
PF: predicated region fallthrough
CT: control target
= control target key end

     0   :  { %s28_s0 = inlined_call_operand.vmem [shape: f32[8], index: 0, kind: input, shape index: {}]   ;;  %s29_s1 = inlined_call_operand.vmem [shape: f32[16,8], index: 1, kind: output, shape index: {}]  }
   0x1   :  { %v4_v0 = vld [vmem:[%s28_s0] ss:$0 sm:$0xff] }
   0x2   :  { %5 = vst [vmem:[%s29_s1] sm:$0xff] %v4_v0 }
   0x3   :  { %8 = vst [vmem:[%s29_s1 + $0x8] sm:$0xff] %v4_v0 }

// kernel: tile.9
= control target key start
LH: loop header
LB: loop body
LE: loop exit
PB: predicated region body
PF: predicated region fallthrough
CT: control target
= control target key end

     0   :  { %s131_s10 = smov 120   ;;  %s132_s11 = smov 104   ;;  %vm3_vm0 = vcmask 64512   ;;  %vm9_vm1 = vcmask 1048512   ;;  %vm15_vm2 = vcmask 982912   ;;  %vm21_vm3 = vcmask 917312   ;;  %s207_s0 = inlined_call_operand.vmem [shape: f32[16,8], index: 0, kind: input, shape index: {}]   ;;  %s208_s1 = inlined_call_operand.vmem [shape: f32[1,128], index: 1, kind: output, shape index: {}]  }
   0x1   :  { %v101_v0 = vld [vmem:[%s207_s0 + $0xf] sm:$0x1]   ;;  %v103_v1 = vld [vmem:[%s207_s0 + $0xd] sm:$0x1]   ;;  %v105_v2 = vld [vmem:[%s207_s0 + $0xb] sm:$0x1]  }
   0x2   :  { %7 = vrot.lane.b32.xlu0 %v101_v0, %s131_s10  ;;  %19 = vrot.lane.b32.xlu1 %v103_v1, %s132_s11  ;;  %s133_s14 = smov 88   ;;  %v102_v3 = vld [vmem:[%s207_s0 + $0xe] sm:$0x1]   ;;  %v104_v4 = vld [vmem:[%s207_s0 + $0xc] sm:$0x1]   ;;  %s134_s19 = smov 112  }
   0x3   :  { %31 = vrot.lane.b32.xlu2 %v105_v2, %s133_s14  ;;  %s135_s20 = smov 96   ;;  %v106_v5 = vld [vmem:[%s207_s0 + $0xa] sm:$0x1]   ;;  %s136_s23 = smov 80   ;;  %v107_v6 = vld [vmem:[%s207_s0 + $0x9] sm:$0x1]  }
   0x4   :  { %v108_v7 = vld [vmem:[%s207_s0 + $0x8] sm:$0x1]   ;;  %s137_s28 = smov 72   ;;  %s138_s29 = smov 64   ;;  %v109_v8 = vld [vmem:[%s207_s0 + $0x7] sm:$0x1]  }
   0x5   :  { %s139_s3 = smov 56   ;;  %v110_v9 = vld [vmem:[%s207_s0 + $0x6] sm:$0x1]   ;;  %v111_v10 = vld [vmem:[%s207_s0 + $0x5] sm:$0x1]   ;;  %s140_s8 = smov 48  }
   0x6   :  { %s141_s9 = smov 40   ;;  %v112_v11 = vld [vmem:[%s207_s0 + $0x4] sm:$0x1]   ;;  %s142_s12 = smov 32   ;;  %v113_v12 = vld [vmem:[%s207_s0 + $0x3] sm:$0x1]  }
   0x7   :  { %v114_v13 = vld [vmem:[%s207_s0 + $0x2] sm:$0x1]   ;;  %s143_s17 = smov 24   ;;  %s144_s18 = smov 16   ;;  %v115_v14 = vld [vmem:[%s207_s0 + $0x1] sm:$0x1]  }
   0x8   :  { %s145_s21 = smov 8   ;;  %v2_v15 = vld [vmem:[%s207_s0] sm:$0x1]   ;;  %vm27_vm4 = vcmask 851712   ;;  %vm33_vm5 = vcmask 786112   ;;  %vm39_vm6 = vcmask 720512  }
   0x9   :  { %4 = vst.msk [vmem:[#allocation0] sm:$0x1] %vm3_vm0, %v2_v15   ;;  %vm45_vm7 = vcmask 654912   ;;  %vm51_vm8 = vcmask 589312   ;;  %vm57_vm9 = vcmask 523712   ;;  %vm63_vm10 = vcmask 458112  }
   0xa   :  { %13 = vrot.lane.b32.xlu0 %v102_v3, %s134_s19  ;;  %25 = vrot.lane.b32.xlu1 %v104_v4, %s135_s20  ;;  %vm69_vm11 = vcmask 392512   ;;  %vm75_vm12 = vcmask 326912   ;;  %vm81_vm13 = vcmask 261312   ;;  %vm87_vm14 = vcmask 195712  }
   0xb   :  { %37 = vrot.lane.b32.xlu2 %v106_v5, %s136_s23  ;;  %vm93_vm15 = vcmask 130112  }
  0x12   :  { %43 = vrot.lane.b32.xlu0 %v107_v6, %s137_s28  ;;  %49 = vrot.lane.b32.xlu1 %v108_v7, %s138_s29 }
  0x13   :  { %55 = vrot.lane.b32.xlu2 %v109_v8, %s139_s3 }
  0x1a   :  { %61 = vrot.lane.b32.xlu0 %v110_v9, %s140_s8  ;;  %67 = vrot.lane.b32.xlu1 %v111_v10, %s141_s9 }
  0x1b   :  { %73 = vrot.lane.b32.xlu2 %v112_v11, %s142_s12 }
  0x22   :  { %79 = vrot.lane.b32.xlu0 %v113_v12, %s143_s17  ;;  %85 = vrot.lane.b32.xlu1 %v114_v13, %s144_s18 }
  0x23   :  { %91 = vrot.lane.b32.xlu2 %v115_v14, %s145_s21 }
  0x5d   :  { %v32_v16 = vpop.permute.xlu2 %31  }
  0x65   :  { %v38_v17 = vpop.permute.xlu2 %37  }
  0x6d   :  { %v56_v18 = vpop.permute.xlu2 %55  }
  0x74   :  { %v8_v19 = vpop.permute.xlu0 %7   ;;  %v20_v20 = vpop.permute.xlu1 %19  }
  0x75   :  { %10 = vst.msk [vmem:[#allocation0] sm:$0x1] %vm9_vm1, %v8_v19   ;;  %v74_v21 = vpop.permute.xlu2 %73  }
  0x7c   :  { %v14_v22 = vpop.permute.xlu0 %13   ;;  %v26_v23 = vpop.permute.xlu1 %25  }
  0x7d   :  { %16 = vst.msk [vmem:[#allocation0] sm:$0x1] %vm15_vm2, %v14_v22   ;;  %v92_v24 = vpop.permute.xlu2 %91  }
  0x7e   :  { %22 = vst.msk [vmem:[#allocation0] sm:$0x1] %vm21_vm3, %v20_v20  }
  0x7f   :  { %28 = vst.msk [vmem:[#allocation0] sm:$0x1] %vm27_vm4, %v26_v23  }
  0x80   :  { %34 = vst.msk [vmem:[#allocation0] sm:$0x1] %vm33_vm5, %v32_v16  }
  0x81   :  { %40 = vst.msk [vmem:[#allocation0] sm:$0x1] %vm39_vm6, %v38_v17  }
  0x84   :  { %v44_v25 = vpop.permute.xlu0 %43   ;;  %v50_v26 = vpop.permute.xlu1 %49  }
  0x85   :  { %46 = vst.msk [vmem:[#allocation0] sm:$0x1] %vm45_vm7, %v44_v25  }
  0x86   :  { %52 = vst.msk [vmem:[#allocation0] sm:$0x1] %vm51_vm8, %v50_v26  }
  0x87   :  { %58 = vst.msk [vmem:[#allocation0] sm:$0x1] %vm57_vm9, %v56_v18  }
  0x8c   :  { %v62_v27 = vpop.permute.xlu0 %61   ;;  %v68_v28 = vpop.permute.xlu1 %67  }
  0x8d   :  { %64 = vst.msk [vmem:[#allocation0] sm:$0x1] %vm63_vm10, %v62_v27  }
  0x8e   :  { %70 = vst.msk [vmem:[#allocation0] sm:$0x1] %vm69_vm11, %v68_v28  }
  0x8f   :  { %76 = vst.msk [vmem:[#allocation0] sm:$0x1] %vm75_vm12, %v74_v21  }
  0x94   :  { %v80_v29 = vpop.permute.xlu0 %79   ;;  %v86_v30 = vpop.permute.xlu1 %85  }
  0x95   :  { %82 = vst.msk [vmem:[#allocation0] sm:$0x1] %vm81_vm13, %v80_v29  }
  0x96   :  { %88 = vst.msk [vmem:[#allocation0] sm:$0x1] %vm87_vm14, %v86_v30  }
  0x97   :  { %94 = vst.msk [vmem:[#allocation0] sm:$0x1] %vm93_vm15, %v92_v24  }
  0x9e   :  { %v97_v31 = vld [vmem:[#allocation0] sm:$0x1] }
  0x9f   :  { %100 = vst [vmem:[%s208_s1] sm:$0x1] %v97_v31 }

// kernel: alias_conv_block.1
= control target key start
LH: loop header
LB: loop body
LE: loop exit
PB: predicated region body
PF: predicated region fallthrough
CT: control target
= control target key end

     0   :  { %vm20_vm0 = vsmask.f32 3328  ;;  %vm21_vm1 = vsmask.f32 7440  ;;  %vm79_vm2 = vcmask 1042432   ;;  %vm80_vm3 = vcmask 1046532   ;;  %s697_s1 = inlined_call_operand.vmem [shape: bf16[384,128], index: 1, kind: input, shape index: {}]   ;;  %s698_s0 = inlined_call_operand.vmem [shape: bf16[2,32,128], index: 0, kind: input, shape index: {}]   ;;  %s699_s2 = inlined_call_operand.vmem [shape: f32[1,128], index: 2, kind: input, shape index: {}]   ;;  %s700_s3 = inlined_call_operand.vmem [shape: f32[2,16,128], index: 3, kind: output, shape index: {}]  }
   0x1   :  { %v502_v0 = vld [vmem:[%s697_s1 + $0x38] sm:$0xff]  ;;  %v501_v3 = vld [vmem:[%s697_s1 + $0x30] sm:$0xff]  ;;  %v500_v6 = vld [vmem:[%s697_s1 + $0x28] sm:$0xff] }
   0x2   :  { %v510_v1 = vld [vmem:[%s697_s1 + $0x78] sm:$0xff]  ;;  %318 = vmatpush.bf16.msra.mxu0 %v502_v0  ;;  %v509_v4 = vld [vmem:[%s697_s1 + $0x70] sm:$0xff]  ;;  %519 = vmatpush.bf16.msra.mxu3 %v502_v0  ;;  %v508_v7 = vld [vmem:[%s697_s1 + $0x68] sm:$0xff] }
   0x3   :  { %v518_v2 = vld [vmem:[%s697_s1 + $0xb8] sm:$0xff]  ;;  %337 = vmatpush.bf16.msra.mxu1 %v510_v1  ;;  %v517_v5 = vld [vmem:[%s697_s1 + $0xb0] sm:$0xff]  ;;  %v516_v8 = vld [vmem:[%s697_s1 + $0xa8] sm:$0xff] }
   0x4   :  { %356 = vmatpush.bf16.msra.mxu2 %v518_v2  ;;  %v14_v9 = vld [vmem:[%s698_s0] sm:$0xf]  ;;  %v15_v10 = vld [vmem:[%s698_s0 + $0x4] sm:$0xf]  ;;  %v18_v18 = vld [vmem:[%s698_s0 + $0x8] sm:$0x1] }
   0x5   :  { %v24_v11 = vshrl.u32 %v14_v9, 16  ;;  %v27_v12 = vshll.u32 %v14_v9, 16  ;;  %v33_v13 = vshll.u32 %v15_v10, 16  ;;  %v37_v14 = vshrl.u32 %v15_v10, 16  ;;  %v499_v15 = vld [vmem:[%s697_s1 + $0x20] sm:$0xff]  ;;  %v498_v23 = vld [vmem:[%s697_s1 + $0x18] sm:$0xff]  ;;  %vm615_vm4 = vmor %vm20_vm0, %vm21_vm1 }
   0x6   :  { %319 = vmatpush.bf16.msra.mxu0 %v501_v3  ;;  %520 = vmatpush.bf16.msra.mxu3 %v501_v3  ;;  %v507_v16 = vld [vmem:[%s697_s1 + $0x60] sm:$0xff]  ;;  %v506_v24 = vld [vmem:[%s697_s1 + $0x58] sm:$0xff]  ;;  %v43_v27 = vshll.u32 %v18_v18, 16  ;;  %v84_v30 = vrot.slane %v15_v10, 5  ;;  %v497_v31 = vld [vmem:[%s697_s1 + $0x10] sm:$0xff]  ;;  %v87_v43 = vrot.slane %v18_v18, 5 }
   0x7   :  { %338 = vmatpush.bf16.msra.mxu1 %v509_v4  ;;  %v515_v17 = vld [vmem:[%s697_s1 + $0xa0] sm:$0xff]  ;;  %v26_v19 = vrot.slane %v24_v11, 4  ;;  %v29_v20 = vrot.slane %v27_v12, 5  ;;  %v35_v21 = vrot.slane %v33_v13, 5  ;;  %v39_v22 = vrot.slane %v37_v14, 4  ;;  %v514_v28 = vld [vmem:[%s697_s1 + $0x98] sm:$0xff]  ;;  %vm629_vm5 = vmor %vm79_vm2, %vm80_vm3 }
   0x8   :  { %357 = vmatpush.bf16.msra.mxu2 %v517_v5  ;;  %v71_v29 = vld [vmem:[%s698_s0] sm:$0xe]  ;;  %v505_v32 = vld [vmem:[%s697_s1 + $0x50] sm:$0xff]  ;;  %v45_v37 = vrot.slane %v43_v27, 5  ;;  %v86_v42 = vrot.slane %v84_v30, 4  ;;  %v496_v47 = vld [vmem:[%s697_s1 + $0x8] sm:$0xff] }
   0x9   :  { %v30_v25 = vor.u32 %v29_v20, %v26_v19  ;;  %v40_v26 = vor.u32 %v39_v22, %v35_v21  ;;  %v16_v33 = vld [vmem:[%s698_s0 + $0x10] sm:$0xf]  ;;  %v387_v38 = vrot.slane %v71_v29, 9  ;;  %v622_v39 = vld [vmem:[%s698_s0 + $0x14] sm:$0xf]  ;;  %v504_v48 = vld [vmem:[%s697_s1 + $0x48] sm:$0xff] }
   0xa   :  { %320 = vmatpush.bf16.msra.mxu0 %v500_v6  ;;  %521 = vmatpush.bf16.msra.mxu3 %v500_v6  ;;  %v513_v40 = vld [vmem:[%s697_s1 + $0x90] sm:$0xff]  ;;  %v48_v44 = vshrl.u32 %v16_v33, 16  ;;  %v51_v45 = vshll.u32 %v16_v33, 16  ;;  %v57_v46 = vshll.u32 %v622_v39, 16  ;;  %v61_v52 = vshrl.u32 %v622_v39, 16  ;;  %v512_v53 = vld [vmem:[%s697_s1 + $0x88] sm:$0xff] }
   0xb   :  { %339 = vmatpush.bf16.msra.mxu1 %v508_v7  ;;  %v31_v35 = vrot.slane %v30_v25, 4  ;;  %v41_v36 = vrot.slane %v40_v26, 4  ;;  %v85_v51 = vsel %vm629_vm5, %v387_v38, %v84_v30  ;;  %v88_v54 = vsel %vm629_vm5, %v86_v42, %v87_v43  ;;  %v495_v59 = vld [vmem:[%s697_s1] sm:$0xff]  ;;  %v19_v2 = vld [vmem:[%s698_s0 + $0x18] sm:$0x1]  ;;  %v494_v6 = vld [vmem:[%s698_s0 + $0x10] sm:$0xff] }
   0xc   :  { %358 = vmatpush.bf16.msra.mxu2 %v516_v8  ;;  %v114_v57 = vunpack.c.l.b16 %v85_v51  ;;  %v50_v58 = vrot.slane %v48_v44, 4  ;;  %v503_v60 = vld [vmem:[%s697_s1 + $0x40] sm:$0xff]  ;;  %v115_v61 = vunpack.c.l.b16 %v88_v54  ;;  %v53_v62 = vrot.slane %v51_v45, 5  ;;  %v72_v11 = vld [vmem:[%s698_s0 + $0x10] sm:$0xe] }
   0xd   :  { %v36_v49 = vsel %vm615_vm4, %v31_v35, %v35_v21  ;;  %v46_v50 = vsel %vm615_vm4, %v41_v36, %v45_v37  ;;  %v59_v63 = vrot.slane %v57_v46, 5  ;;  %v63_v0 = vrot.slane %v61_v52, 4  ;;  %v511_v1 = vld [vmem:[%s697_s1 + $0x80] sm:$0xff] }
   0xe   :  { %321 = vmatpush.bf16.msra.mxu0 %v499_v15  ;;  %522 = vmatpush.bf16.msra.mxu3 %v499_v15  ;;  %v106_v55 = vunpack.c.l.b16 %v36_v49  ;;  %v107_v56 = vunpack.c.l.b16 %v46_v50  ;;  %v493_v3 = vld [vmem:[%s698_s0] sm:$0xff]  ;;  %v118_v5 = vpack.c.b16 %v115_v61, %v114_v57  ;;  %v54_v7 = vor.u32 %v53_v62, %v50_v58 }
   0xf   :  { %340 = vmatpush.bf16.msra.mxu1 %v507_v16  ;;  %v64_v8 = vor.u32 %v63_v0, %v59_v63  ;;  %v67_v9 = vshll.u32 %v19_v2, 16  ;;  %v91_v10 = vrot.slane %v622_v39, 5  ;;  %v388_v15 = vrot.slane %v72_v11, 9 }
  0x10   :  { %359 = vmatpush.bf16.msra.mxu2 %v515_v17  ;;  %v110_v4 = vpack.c.b16 %v107_v56, %v106_v55  ;;  %v55_v12 = vrot.slane %v54_v7, 4  ;;  %v94_v17 = vrot.slane %v19_v2, 5 }
  0x11   :  { %v65_v13 = vrot.slane %v64_v8, 4  ;;  %v69_v14 = vrot.slane %v67_v9, 5  ;;  %v93_v16 = vrot.slane %v91_v10, 4  ;;  %v92_v20 = vsel %vm629_vm5, %v388_v15, %v91_v10 }
  0x12   :  { %322 = vmatpush.bf16.msra.mxu0 %v498_v23  ;;  %523 = vmatpush.bf16.msra.mxu3 %v498_v23  ;;  %v60_v18 = vsel %vm615_vm4, %v55_v12, %v59_v63 }
  0x13   :  { %341 = vmatpush.bf16.msra.mxu1 %v506_v24  ;;  %v70_v19 = vsel %vm615_vm4, %v65_v13, %v69_v14  ;;  %v95_v21 = vsel %vm629_vm5, %v93_v16, %v94_v17  ;;  %v108_v22 = vunpack.c.l.b16 %v60_v18  ;;  %v116_v24 = vunpack.c.l.b16 %v92_v20 }
  0x14   :  { %360 = vmatpush.bf16.msra.mxu2 %v514_v28  ;;  %v109_v23 = vunpack.c.l.b16 %v70_v19  ;;  %v117_v25 = vunpack.c.l.b16 %v95_v21  ;;  %v527_v28 = vld [vmem:[%s699_s2] ss:$0 sm:$0xff] }
  0x16   :  { %323 = vmatpush.bf16.msra.mxu0 %v497_v31  ;;  %524 = vmatpush.bf16.msra.mxu3 %v497_v31  ;;  %v111_v26 = vpack.c.b16 %v109_v23, %v108_v22  ;;  %v119_v27 = vpack.c.b16 %v117_v25, %v116_v24 }
  0x17   :  { %342 = vmatpush.bf16.msra.mxu1 %v505_v32 }
  0x18   :  { %361 = vmatpush.bf16.msra.mxu2 %v513_v40 }
  0x1a   :  { %324 = vmatpush.bf16.msra.mxu0 %v496_v47  ;;  %525 = vmatpush.bf16.msra.mxu3 %v496_v47 }
  0x1b   :  { %343 = vmatpush.bf16.msra.mxu1 %v504_v48 }
  0x1c   :  { %362 = vmatpush.bf16.msra.mxu2 %v512_v53 }
  0x1e   :  { %325 = vmatpush.bf16.msra.mxu0 %v495_v59  ;;  %526 = vmatpush.bf16.msra.mxu3 %v495_v59 }
  0x1f   :  { %344 = vmatpush.bf16.msra.mxu1 %v503_v60 }
  0x20   :  { %363 = vmatpush.bf16.msra.mxu2 %v511_v1 }
  0x21   :  { %326 = vmatmul.bf16.vlgmr.msra.gmra.mxu0 %v493_v3  ;;  %331 = vmatmul.bf16.vlgmr.msra.gmra.mxu3 %v494_v6 }
  0x22   :  { %345 = vmatmul.bf16.vlgmr.msra.gmra.mxu1 %v110_v4 }
  0x23   :  { %364 = vmatmul.bf16.vlgmr.msra.gmra.mxu2 %v118_v5 }
  0x32   :  { %350 = vmatmul.bf16.gmra.mxu1 %v111_v26 }
  0x33   :  { %369 = vmatmul.bf16.gmra.mxu2 %v119_v27 }
  0x9e   :  { %v327_v29 = vpop.f32.mrf.mxu0 }
  0x9f   :  { %v346_v30 = vpop.f32.mrf.mxu1  ;;  %v328_v31 = vadd.f32 %v527_v28, %v327_v29 }
  0xa1   :  { %v347_v32 = vadd.f32 %v346_v30, %v328_v31 }
  0xa4   :  { %v332_v40 = vpop.f32.mrf.mxu3 }
  0xa5   :  { %v333_v42 = vadd.f32 %v527_v28, %v332_v40 }
  0xa6   :  { %v365_v33 = vpop.f32.mrf.mxu2  ;;  %v329_v35 = vpop.f32.mrf.mxu0 }
  0xa7   :  { %v366_v34 = vadd.f32 %v365_v33, %v347_v32  ;;  %v348_v36 = vpop.f32.mrf.mxu1  ;;  %v330_v38 = vadd.f32 %v527_v28, %v329_v35 }
  0xa9   :  { %v375_v37 = vmax.f32 %v366_v34, 0.0  ;;  %v349_v39 = vadd.f32 %v348_v36, %v330_v38 }
  0xab   :  { %379 = vst [vmem:[%s700_s3] sm:$0xff] %v375_v37 }
  0xac   :  { %v334_v49 = vpop.f32.mrf.mxu3 }
  0xad   :  { %v335_v52 = vadd.f32 %v527_v28, %v334_v49 }
  0xae   :  { %v367_v41 = vpop.f32.mrf.mxu2 }
  0xaf   :  { %v368_v43 = vadd.f32 %v367_v41, %v349_v39  ;;  %v351_v44 = vpop.f32.mrf.mxu1 }
  0xb0   :  { %v352_v46 = vadd.f32 %v351_v44, %v333_v42 }
  0xb1   :  { %v376_v45 = vmax.f32 %v368_v43, 0.0 }
  0xb3   :  { %380 = vst [vmem:[%s700_s3 + $0x8] sm:$0xff] %v376_v45 }
  0xb6   :  { %v370_v47 = vpop.f32.mrf.mxu2 }
  0xb7   :  { %v371_v48 = vadd.f32 %v370_v47, %v352_v46  ;;  %v353_v51 = vpop.f32.mrf.mxu1 }
  0xb8   :  { %v354_v53 = vadd.f32 %v353_v51, %v335_v52 }
  0xb9   :  { %v377_v50 = vmax.f32 %v371_v48, 0.0 }
  0xbb   :  { %381 = vst [vmem:[%s700_s3 + $0x10] sm:$0xff] %v377_v50 }
  0xbe   :  { %v372_v54 = vpop.f32.mrf.mxu2 }
  0xbf   :  { %v373_v55 = vadd.f32 %v372_v54, %v354_v53 }
  0xc1   :  { %v378_v56 = vmax.f32 %v373_v55, 0.0 }
  0xc3   :  { %382 = vst [vmem:[%s700_s3 + $0x18] sm:$0xff] %v378_v56 }

</bundles_post_ra>
